<compile_context>
chip_gen: v7x
topology: tpu7x:2x2x1
jax: 0.10.0
libtpu: 0.0.40
codegen_flags: <defaults>
</compile_context>

<pallas_src>
import functools

import jax
import jax.numpy as jnp
from jax.experimental import pallas as pl
from jax.experimental.pallas import tpu as pltpu

_BN_EPS = 1e-5


# ----------------------------------------------------------------------------
# Fused ResBlock kernel
# ----------------------------------------------------------------------------
def _resblock_kernel(x_ref, w1_ref, s1_ref, b1_ref, w2_ref, s2_ref, b2_ref,
                     o_ref, *, L):
    """Fused ResBlock on a (N*L, C) activation slab.

    x_ref:           (N*L, C)    f32 input (NLC layout, batch flattened)
    w1_ref, w2_ref:  (3*C, C)    bf16 stacked conv weights (taps l-1, l, l+1)
    s*_ref, b*_ref:  (1, C)      f32 folded BatchNorm scale / shift
    o_ref:           (N*L, C)    f32 output
    """
    x = x_ref[...]                                   # (NL, C) f32
    nl = x.shape[0]

    # Per-sample boundary masks, built once and reused by both convs
    # (JAX does not CSE broadcast_in_dim — do not rebuild per conv).
    row = jax.lax.broadcasted_iota(jnp.int32, x.shape, 0)
    pos = row % L
    is_first = pos == 0
    is_last = pos == (L - 1)

    def conv3_bn(inp, w_ref, s_ref, b_ref):
        # Shifted copies with zero padding at per-sample boundaries
        # (roll crosses sample boundaries, but those rows are masked to 0).
        x_m1 = jnp.where(is_first, 0.0, pltpu.roll(inp, shift=1, axis=0))
        x_p1 = jnp.where(is_last, 0.0, pltpu.roll(inp, shift=nl - 1, axis=0))
        # One MXU matmul with K = 3*Cin instead of three K = Cin matmuls.
        taps = jnp.concatenate([x_m1, inp, x_p1], axis=1).astype(jnp.bfloat16)
        y = jnp.dot(taps, w_ref[...], preferred_element_type=jnp.float32)
        # Folded BatchNorm (+ conv bias) in f32.
        return y * s_ref[...] + b_ref[...]

    h = jnp.maximum(conv3_bn(x, w1_ref, s1_ref, b1_ref), 0.0)      # conv1+bn1+relu
    y = conv3_bn(h, w2_ref, s2_ref, b2_ref) + x                    # conv2+bn2+res
    o_ref[...] = jnp.maximum(y, 0.0).astype(o_ref.dtype)           # final relu


def resblock_forward(x_ncl, p1, p2):
    """x_ncl: (N, C, L) PyTorch Conv1d layout.  Returns (N, C, L)."""
    N, C, L = x_ncl.shape
    # Layout plumbing (plain JAX glue): NCL -> NLC -> (N*L, C), channels on lanes.
    x_flat = jnp.transpose(x_ncl, (0, 2, 1)).reshape(N * L, C)

    vmem = pl.BlockSpec(memory_space=pltpu.MemorySpace.VMEM)
    out_flat = pl.pallas_call(
        functools.partial(_resblock_kernel, L=L),
        out_shape=jax.ShapeDtypeStruct((N * L, C), jnp.float32),
        in_specs=[vmem] * 7,
        out_specs=vmem,
    )(x_flat,
      p1["w_stacked"], p1["scale"], p1["shift"],
      p2["w_stacked"], p2["scale"], p2["shift"])

    return jnp.transpose(out_flat.reshape(N, L, C), (0, 2, 1))


# ----------------------------------------------------------------------------
# Parameters (PyTorch shapes, folded / stacked to kernel layout)
# ----------------------------------------------------------------------------
def _conv_bn_params(key, cin, cout):
    k1, k2, k3, k4, k5, k6 = jax.random.split(key, 6)
    w = 0.1 * jax.random.normal(k1, (cout, cin, 3), jnp.float32)   # PyTorch (Cout,Cin,K)
    b = 0.1 * jax.random.normal(k2, (cout,), jnp.float32)
    gamma = 1.0 + 0.1 * jax.random.normal(k3, (cout,), jnp.float32)
    beta = 0.1 * jax.random.normal(k4, (cout,), jnp.float32)
    rmean = 0.1 * jax.random.normal(k5, (cout,), jnp.float32)
    rvar = 1.0 + 0.1 * jnp.abs(jax.random.normal(k6, (cout,), jnp.float32))

    # Folded eval-mode BN: y = scale * conv(x) + shift
    scale = gamma / jnp.sqrt(rvar + _BN_EPS)
    shift = beta + (b - rmean) * scale
    # Stacked conv weight: row index k*Cin + ci  ->  (3*Cin, Cout), bf16 for MXU.
    w_stacked = jnp.transpose(w, (2, 1, 0)).reshape(3 * cin, cout)

    return dict(
        w_stacked=w_stacked.astype(jnp.bfloat16),
        scale=scale.reshape(1, cout),
        shift=shift.reshape(1, cout),
        # Raw parameters kept for the pure-JAX reference check.
        raw=dict(w=w, b=b, gamma=gamma, beta=beta, rmean=rmean, rvar=rvar),
    )


# ----------------------------------------------------------------------------
# Pure-JAX reference (f32) for correctness check
# ----------------------------------------------------------------------------
def _conv_bn_ref(x_ncl, raw):
    y = jax.lax.conv_general_dilated(
        x_ncl, raw["w"], window_strides=(1,), padding=((1, 1),),
        dimension_numbers=("NCH", "OIH", "NCH"))
    y = y + raw["b"][None, :, None]
    inv = 1.0 / jnp.sqrt(raw["rvar"] + _BN_EPS)
    return (raw["gamma"][None, :, None] * (y - raw["rmean"][None, :, None])
            * inv[None, :, None] + raw["beta"][None, :, None])


def resblock_reference(x_ncl, p1, p2):
    h = jax.nn.relu(_conv_bn_ref(x_ncl, p1["raw"]))
    y = _conv_bn_ref(h, p2["raw"]) + x_ncl
    return jax.nn.relu(y)


# ----------------------------------------------------------------------------
if __name__ == "__main__":
    key = jax.random.PRNGKey(0)
    k_in, k1, k2 = jax.random.split(key, 3)

    N, C, L = 2, 32, 16            # batch, channels (in == out for residual), length
    x = jax.random.normal(k_in, (N, C, L), jnp.float32)

    p1 = _conv_bn_params(k1, C, C)
    p2 = _conv_bn_params(k2, C, C)

    fwd = jax.jit(resblock_forward)
    out = fwd(x, p1, p2)
    jax.block_until_ready(out)

    ref = resblock_reference(x, p1, p2)

    assert out.shape == (N, C, L)
    assert bool(jnp.all(jnp.isfinite(out)))
    # bf16 matmul inputs with f32 accumulation -> loose-ish tolerance.
    assert bool(jnp.allclose(out, ref, atol=5e-2, rtol=5e-2)), (
        float(jnp.max(jnp.abs(out - ref))))
    print("KERNEL_OK")
</pallas_src>

<mosaic_0001>
module attributes {stable_mosaic.version = 11 : i64} {
  func.func @_resblock_kernel(%arg0: memref<32x32xf32, #tpu.memory_space<vmem>>, %arg1: memref<96x32xbf16, #tpu.memory_space<vmem>>, %arg2: memref<1x32xf32, #tpu.memory_space<vmem>>, %arg3: memref<1x32xf32, #tpu.memory_space<vmem>>, %arg4: memref<96x32xbf16, #tpu.memory_space<vmem>>, %arg5: memref<1x32xf32, #tpu.memory_space<vmem>>, %arg6: memref<1x32xf32, #tpu.memory_space<vmem>>, %arg7: memref<32x32xf32, #tpu.memory_space<vmem>>) attributes {dimension_semantics = [], scalar_prefetch = 0 : i64, scratch_operands = 0 : i64, tpu.core_type = #tpu.core_type<tc>} {
    %c0 = arith.constant 0 : index
    %c0_0 = arith.constant 0 : index
    %0 = vector.load %arg0[%c0, %c0_0] : memref<32x32xf32, #tpu.memory_space<vmem>>, vector<32x32xf32>
    %1 = tpu.iota {dimensions = array<i32: 0>} : vector<32x32xi32>
    %c16_i32 = arith.constant 16 : i32
    %c0_i32 = arith.constant 0 : i32
    %2 = arith.cmpi eq, %c16_i32, %c0_i32 : i32
    %c1_i32 = arith.constant 1 : i32
    %3 = arith.select %2, %c1_i32, %c16_i32 : i32
    %4 = vector.broadcast %3 : i32 to vector<32x32xi32>
    %5 = arith.remsi %1, %4 : vector<32x32xi32>
    %c0_i32_1 = arith.constant 0 : i32
    %6 = vector.broadcast %c0_i32_1 : i32 to vector<32x32xi32>
    %7 = arith.cmpi ne, %5, %6 : vector<32x32xi32>
    %c0_i32_2 = arith.constant 0 : i32
    %8 = vector.broadcast %c0_i32_2 : i32 to vector<32x32xi32>
    %9 = arith.cmpi slt, %5, %8 : vector<32x32xi32>
    %c0_i32_3 = arith.constant 0 : i32
    %10 = arith.cmpi slt, %3, %c0_i32_3 : i32
    %11 = vector.broadcast %10 : i1 to vector<32x32xi1>
    %12 = vector.broadcast %11 : vector<32x32xi1> to vector<32x32xi1>
    %13 = arith.xori %9, %12 : vector<32x32xi1>
    %14 = arith.andi %13, %7 : vector<32x32xi1>
    %15 = vector.broadcast %3 : i32 to vector<32x32xi32>
    %16 = arith.addi %5, %15 : vector<32x32xi32>
    %17 = arith.select %14, %16, %5 : vector<32x32xi1>, vector<32x32xi32>
    %c0_i32_4 = arith.constant 0 : i32
    %18 = vector.broadcast %c0_i32_4 : i32 to vector<32x32xi32>
    %19 = arith.cmpi eq, %17, %18 : vector<32x32xi32>
    %c15_i32 = arith.constant 15 : i32
    %20 = vector.broadcast %c15_i32 : i32 to vector<32x32xi32>
    %21 = arith.cmpi eq, %17, %20 : vector<32x32xi32>
    %c1_i32_5 = arith.constant 1 : i32
    %22 = tpu.dynamic_rotate %0 by %c1_i32_5 dim 0 : vector<32x32xf32>, i32 -> vector<32x32xf32>
    %cst = arith.constant 0.000000e+00 : f32
    %23 = vector.broadcast %cst : f32 to vector<32x32xf32>
    %24 = arith.select %19, %23, %22 : vector<32x32xi1>, vector<32x32xf32>
    %c31_i32 = arith.constant 31 : i32
    %25 = tpu.dynamic_rotate %0 by %c31_i32 dim 0 : vector<32x32xf32>, i32 -> vector<32x32xf32>
    %cst_6 = arith.constant 0.000000e+00 : f32
    %26 = vector.broadcast %cst_6 : f32 to vector<32x32xf32>
    %27 = arith.select %21, %26, %25 : vector<32x32xi1>, vector<32x32xf32>
    %28 = tpu.concatenate %24, %0, %27 in 1 : vector<32x32xf32>, vector<32x32xf32>, vector<32x32xf32> -> vector<32x96xf32>
    %29 = arith.truncf %28 : vector<32x96xf32> to vector<32x96xbf16>
    %c0_7 = arith.constant 0 : index
    %c0_8 = arith.constant 0 : index
    %30 = vector.load %arg1[%c0_7, %c0_8] : memref<96x32xbf16, #tpu.memory_space<vmem>>, vector<96x32xbf16>
    %cst_9 = arith.constant dense<0.000000e+00> : vector<32x32xf32>
    %31 = tpu.matmul %29, %30, %cst_9 {dimension_numbers = #tpu.dot_dimension_numbers<[1], [0], [0], [1], [0, 0, 1, 1], [], []>} : vector<32x96xbf16>, vector<96x32xbf16>, vector<32x32xf32> -> vector<32x32xf32>
    %c0_10 = arith.constant 0 : index
    %c0_11 = arith.constant 0 : index
    %32 = vector.load %arg2[%c0_10, %c0_11] : memref<1x32xf32, #tpu.memory_space<vmem>>, vector<1x32xf32>
    %33 = vector.broadcast %32 : vector<1x32xf32> to vector<32x32xf32>
    %34 = arith.mulf %31, %33 : vector<32x32xf32>
    %c0_12 = arith.constant 0 : index
    %c0_13 = arith.constant 0 : index
    %35 = vector.load %arg3[%c0_12, %c0_13] : memref<1x32xf32, #tpu.memory_space<vmem>>, vector<1x32xf32>
    %36 = vector.broadcast %35 : vector<1x32xf32> to vector<32x32xf32>
    %37 = arith.addf %34, %36 : vector<32x32xf32>
    %cst_14 = arith.constant 0.000000e+00 : f32
    %38 = vector.broadcast %cst_14 : f32 to vector<32x32xf32>
    %39 = arith.maximumf %37, %38 : vector<32x32xf32>
    %c1_i32_15 = arith.constant 1 : i32
    %40 = tpu.dynamic_rotate %39 by %c1_i32_15 dim 0 : vector<32x32xf32>, i32 -> vector<32x32xf32>
    %cst_16 = arith.constant 0.000000e+00 : f32
    %41 = vector.broadcast %cst_16 : f32 to vector<32x32xf32>
    %42 = arith.select %19, %41, %40 : vector<32x32xi1>, vector<32x32xf32>
    %c31_i32_17 = arith.constant 31 : i32
    %43 = tpu.dynamic_rotate %39 by %c31_i32_17 dim 0 : vector<32x32xf32>, i32 -> vector<32x32xf32>
    %cst_18 = arith.constant 0.000000e+00 : f32
    %44 = vector.broadcast %cst_18 : f32 to vector<32x32xf32>
    %45 = arith.select %21, %44, %43 : vector<32x32xi1>, vector<32x32xf32>
    %46 = tpu.concatenate %42, %39, %45 in 1 : vector<32x32xf32>, vector<32x32xf32>, vector<32x32xf32> -> vector<32x96xf32>
    %47 = arith.truncf %46 : vector<32x96xf32> to vector<32x96xbf16>
    %c0_19 = arith.constant 0 : index
    %c0_20 = arith.constant 0 : index
    %48 = vector.load %arg4[%c0_19, %c0_20] : memref<96x32xbf16, #tpu.memory_space<vmem>>, vector<96x32xbf16>
    %cst_21 = arith.constant dense<0.000000e+00> : vector<32x32xf32>
    %49 = tpu.matmul %47, %48, %cst_21 {dimension_numbers = #tpu.dot_dimension_numbers<[1], [0], [0], [1], [0, 0, 1, 1], [], []>} : vector<32x96xbf16>, vector<96x32xbf16>, vector<32x32xf32> -> vector<32x32xf32>
    %c0_22 = arith.constant 0 : index
    %c0_23 = arith.constant 0 : index
    %50 = vector.load %arg5[%c0_22, %c0_23] : memref<1x32xf32, #tpu.memory_space<vmem>>, vector<1x32xf32>
    %51 = vector.broadcast %50 : vector<1x32xf32> to vector<32x32xf32>
    %52 = arith.mulf %49, %51 : vector<32x32xf32>
    %c0_24 = arith.constant 0 : index
    %c0_25 = arith.constant 0 : index
    %53 = vector.load %arg6[%c0_24, %c0_25] : memref<1x32xf32, #tpu.memory_space<vmem>>, vector<1x32xf32>
    %54 = vector.broadcast %53 : vector<1x32xf32> to vector<32x32xf32>
    %55 = arith.addf %52, %54 : vector<32x32xf32>
    %56 = arith.addf %55, %0 : vector<32x32xf32>
    %cst_26 = arith.constant 0.000000e+00 : f32
    %57 = vector.broadcast %cst_26 : f32 to vector<32x32xf32>
    %58 = arith.maximumf %56, %57 : vector<32x32xf32>
    %c0_27 = arith.constant 0 : index
    %c0_28 = arith.constant 0 : index
    %59 = vector.load %arg7[%c0_27, %c0_28] : memref<32x32xf32, #tpu.memory_space<vmem>>, vector<32x32xf32>
    tpu.vector_store %arg7[%c0_27, %c0_28], %58 {strides = array<i32>} : memref<32x32xf32, #tpu.memory_space<vmem>>, vector<32x32xf32>,
    return
  }
}

</mosaic_0001>

<bundles_post_ra>
// kernel: resblock_forward.1
= control target key start
LH: loop header
LB: loop body
LE: loop exit
PB: predicated region body
PF: predicated region fallthrough
CT: control target
= control target key end

     0   :  { %v32_v3 = vlaneseq  ;;  %s661_s9 = smov 32   ;;  %s662_s17 = smov 64   ;;  %s906_s0 = inlined_call_operand.vmem [shape: f32[32,32], index: 0, kind: input, shape index: {}]   ;;  %s907_s1 = inlined_call_operand.vmem [shape: bf16[96,32], index: 1, kind: input, shape index: {}]   ;;  %s908_s2 = inlined_call_operand.vmem [shape: f32[1,32], index: 2, kind: input, shape index: {}]   ;;  %s909_s3 = inlined_call_operand.vmem [shape: f32[1,32], index: 3, kind: input, shape index: {}]   ;;  %s910_s4 = inlined_call_operand.vmem [shape: bf16[96,32], index: 4, kind: input, shape index: {}]   ;;  %s911_s5 = inlined_call_operand.vmem [shape: f32[1,32], index: 5, kind: input, shape index: {}]   ;;  %s912_s6 = inlined_call_operand.vmem [shape: f32[1,32], index: 6, kind: input, shape index: {}]   ;;  %s913_s7 = inlined_call_operand.hbm [shape: f32[32,32], index: 7, kind: output, shape index: {}]  }
   0x1   :  { %v709_v0 = vld [vmem:[%s906_s0] sm:$0xff]  ;;  %v714_v1 = vld [vmem:[%s906_s0 + $0x8] sm:$0xff]  ;;  %v719_v2 = vld [vmem:[%s906_s0 + $0x10] sm:$0xff] }
   0x2   :  { %v585_v4 = vpack.i.bf16 %v714_v1, %v709_v0  ;;  %v726_v5 = vld [vmem:[%s906_s0 + $0x18] sm:$0xff]  ;;  %v728_v6 = vshrl.u32 %v32_v3, 7  ;;  %v106_v7 = vrot.slane %v709_v0, 1  ;;  %v107_v8 = vrot.slane %v714_v1, 1  ;;  %v625_v12 = vld [vmem:[%s907_s1] sm:$0xff]   ;;  %v626_v15 = vld [vmem:[%s907_s1 + $0x8] sm:$0xff]  }
   0x3   :  { %v108_v9 = vrot.slane %v719_v2, 1  ;;  %v590_v10 = vpack.i.bf16 %v726_v5, %v719_v2  ;;  %v109_v11 = vrot.slane %v726_v5, 1  ;;  %548 = vmatprep.subr.bf16.mxu0 %v625_v12  ;;  %v627_v21 = vld [vmem:[%s907_s1 + $0x10] sm:$0xff]   ;;  %v628_v28 = vld [vmem:[%s907_s1 + $0x18] sm:$0xff]   ;;  %v629_v30 = vld [vmem:[%s907_s1 + $0x20] sm:$0xff]  }
   0x4   :  { %586 = vrot.lane.b32.xlu0 %v585_v4, %s661_s9  ;;  %v34_v13 = vadd.s32 8, %v728_v6  ;;  %vm110_vm0 = vcmp.lt.s32.totalorder %v728_v6, 7  ;;  %v36_v14 = vadd.s32 24, %v728_v6  ;;  %549 = vmatpush3.bf16.msra.mxu0 %v625_v12 }
   0x5   :  { %v112_v17 = vsel %vm110_vm0, %v107_v8, %v108_v9  ;;  %v114_v19 = vsel %vm110_vm0, %v109_v11, %v106_v7  ;;  %v113_v20 = vsel %vm110_vm0, %v106_v7, %v107_v8  ;;  %550 = vmatprep.subr.bf16.mxu0 %v626_v15  ;;  %v111_v25 = vsel %vm110_vm0, %v108_v9, %v109_v11 }
   0x6   :  { %v48_v16 = vand.u32 15, %v34_v13  ;;  %v62_v18 = vand.u32 15, %v36_v14 }
   0x8   :  { %591 = vrot.lane.b32.xlu0 %v590_v10, %s661_s9  ;;  %vm756_vm1 = vcmp.eq.s32.totalorder %v48_v16, 15  ;;  %vm760_vm2 = vcmp.eq.s32.totalorder %v62_v18, 15  ;;  %551 = vmatpush3.bf16.msra.mxu0 %v626_v15 }
   0x9   :  { %v116_v24 = vsel %vm756_vm1, 0.0, %v112_v17  ;;  %v118_v26 = vsel %vm760_vm2, 0.0, %v114_v19  ;;  %552 = vmatprep.subr.bf16.mxu0 %v627_v21 }
   0xa   :  { %v595_v27 = vpack.i.bf16 %v116_v24, %v113_v20  ;;  %v600_v29 = vpack.i.bf16 %v118_v26, %v111_v25 }
   0xc   :  { %596 = vrot.lane.b32.xlu1 %v595_v27, %s662_s17  ;;  %553 = vmatpush3.bf16.msra.mxu0 %v627_v21 }
   0xd   :  { %554 = vmatprep.subr.bf16.mxu0 %v628_v28 }
   0xe   :  { %12 = vsyncpa [#allocation3], 0  ;;  %v630_v31 = vld [vmem:[%s907_s1 + $0x28] sm:$0xff]   ;;  %v93_v32 = vrot.slane %v709_v0, 7  ;;  %v96_v33 = vrot.slane %v726_v5, 7  ;;  %v35_v34 = vadd.s32 16, %v728_v6 }
   0xf   :  { %v41_v35 = vand.u32 15, %v728_v6  ;;  %vm97_vm3 = vcmp.lt.s32.totalorder %v728_v6, 1  ;;  %v94_v37 = vrot.slane %v714_v1, 7  ;;  %v95_v39 = vrot.slane %v719_v2, 7  ;;  %v631_v10 = vld [vmem:[%s910_s4] sm:$0xff]   ;;  %v632_v11 = vld [vmem:[%s910_s4 + $0x8] sm:$0xff]  }
  0x10   :  { %601 = vrot.lane.b32.xlu1 %v600_v29, %s662_s17  ;;  %555 = vmatpush3.bf16.msra.mxu0 %v628_v28  ;;  %v55_v38 = vand.u32 15, %v35_v34  ;;  %v101_v41 = vsel %vm97_vm3, %v96_v33, %v93_v32  ;;  %vm151_vm5 = vcmask 261120   ;;  %vm156_vm7 = vcmask 523264   ;;  %v633_v12 = vld [vmem:[%s910_s4 + $0x10] sm:$0xff]   ;;  %v634_v13 = vld [vmem:[%s910_s4 + $0x18] sm:$0xff]   ;;  %v635_v15 = vld [vmem:[%s910_s4 + $0x20] sm:$0xff]  }
  0x11   :  { %556 = vmatprep.subr.bf16.mxu0 %v629_v30  ;;  %vm788_vm4 = vcmp.eq.s32.totalorder %v41_v35, 0  ;;  %v100_v45 = vsel %vm97_vm3, %v93_v32, %v94_v37  ;;  %v99_v48 = vsel %vm97_vm3, %v94_v37, %v95_v39  ;;  %v98_v56 = vsel %vm97_vm3, %v95_v39, %v96_v33  ;;  %564 = vmatprep.subr.bf16.mxu1 %v631_v10  ;;  %v520_v14 = vld [vmem:[%s908_s2] ss:$0 sm:$0xff]  ;;  %v636_v27 = vld [vmem:[%s910_s4 + $0x28] sm:$0xff]  }
  0x12   :  { %v102_v46 = vsel %vm788_vm4, 0.0, %v101_v41  ;;  %vm798_vm6 = vcmp.eq.s32.totalorder %v55_v38, 0  ;;  %vm211_vm8 = vcmask 785408   ;;  %565 = vmatpush3.bf16.msra.mxu1 %v631_v10  ;;  %v521_v17 = vld [vmem:[%s909_s3] ss:$0 sm:$0xff] }
  0x13   :  { %v104_v57 = vsel %vm798_vm6, 0.0, %v99_v48  ;;  %566 = vmatprep.subr.bf16.mxu1 %v632_v11 }
  0x14   :  { %557 = vmatpush3.bf16.msra.mxu0 %v629_v30 }
  0x15   :  { %558 = vmatprep.subr.bf16.mxu0 %v630_v31 }
  0x16   :  { %567 = vmatpush3.bf16.msra.mxu1 %v632_v11 }
  0x17   :  { %568 = vmatprep.subr.bf16.mxu1 %v633_v12 }
  0x18   :  { %559 = vmatpush3.bf16.msra.mxu0 %v630_v31 }
  0x1a   :  { %569 = vmatpush3.bf16.msra.mxu1 %v633_v12 }
  0x1b   :  { %570 = vmatprep.subr.bf16.mxu1 %v634_v13 }
  0x1e   :  { %571 = vmatpush3.bf16.msra.mxu1 %v634_v13 }
  0x1f   :  { %572 = vmatprep.subr.bf16.mxu1 %v635_v15 }
  0x22   :  { %573 = vmatpush3.bf16.msra.mxu1 %v635_v15 }
  0x23   :  { %574 = vmatprep.subr.bf16.mxu1 %v636_v27 }
  0x26   :  { %575 = vmatpush3.bf16.msra.mxu1 %v636_v27 }
  0x76   :  { %v587_v36 = vpop.permute.xlu0 %586 }
  0x77   :  { %v589_v42 = vunpack.i.h.bf16 %v587_v36  ;;  %v588_v43 = vunpack.i.l.bf16 %v587_v36 }
  0x79   :  { %v152_v52 = vsel %vm151_vm5, %v102_v46, %v588_v43  ;;  %v153_v53 = vsel %vm151_vm5, %v100_v45, %v589_v42 }
  0x7a   :  { %v592_v44 = vpop.permute.xlu0 %591 }
  0x7b   :  { %v594_v50 = vunpack.i.h.bf16 %v592_v44  ;;  %v593_v51 = vunpack.i.l.bf16 %v592_v44 }
  0x7d   :  { %v155_v60 = vsel %vm151_vm5, %v98_v56, %v594_v50  ;;  %v154_v61 = vsel %vm151_vm5, %v104_v57, %v593_v51 }
  0x7e   :  { %v597_v49 = vpop.permute.xlu1 %596 }
  0x7f   :  { %v599_v54 = vunpack.i.h.bf16 %v597_v49  ;;  %v598_v55 = vunpack.i.l.bf16 %v597_v49 }
  0x81   :  { %v157_v58 = vsel %vm156_vm7, %v152_v52, %v598_v55  ;;  %v158_v59 = vsel %vm156_vm7, %v153_v53, %v599_v54 }
  0x82   :  { %v602_v62 = vpop.permute.xlu1 %601  ;;  %v161_v63 = vpack.c.bf16 %v158_v59, %v157_v58 }
  0x83   :  { %v604_v3 = vunpack.i.h.bf16 %v602_v62  ;;  %v603_v4 = vunpack.i.l.bf16 %v602_v62 }
  0x84   :  { %560 = vmatprep.mubr.msk.bf16.mxu0 %vm211_vm8, %v161_v63 }
  0x85   :  { %v160_v7 = vsel %vm156_vm7, %v155_v60, %v604_v3  ;;  %v159_v8 = vsel %vm156_vm7, %v154_v61, %v603_v4 }
  0x86   :  { %v162_v9 = vpack.c.bf16 %v160_v7, %v159_v8 }
  0x88   :  { %561 = vmatmul.mubr.msk.bf16.vlgmr.msra.gmra.mrb[0].mxu0 %vm211_vm8, %v162_v9 }
 0x15b   :  { %v562_v16 = vpop.f32.mrb[0].mxu0 }
 0x15c   :  { %v276_v18 = vmul.f32 %v562_v16, %v520_v14  ;;  %v252_v19 = vpop.f32.mrb[1].mxu0 }
 0x15d   :  { %v274_v20 = vmul.f32 %v520_v14, %v252_v19  ;;  %v563_v21 = vpop.f32.mrb[2].mxu0 }
 0x15e   :  { %v287_v24 = vadd.f32 %v521_v17, %v276_v18  ;;  %v277_v25 = vmul.f32 %v563_v21, %v520_v14  ;;  %v255_v26 = vpop.f32.mrb[3].mxu0 }
 0x15f   :  { %v285_v28 = vadd.f32 %v521_v17, %v274_v20  ;;  %v275_v29 = vmul.f32 %v520_v14, %v255_v26  ;;  %v530_v20 = vld [vmem:[%s911_s5] ss:$0 sm:$0xff]  ;;  %s663_s5 = smov [#allocation2]  }
 0x160   :  { %v291_v30 = vmax.f32 %v287_v24, 0.0  ;;  %v288_v31 = vadd.f32 %v521_v17, %v277_v25  ;;  %v531_v24 = vld [vmem:[%s912_s6] ss:$0 sm:$0xff]  ;;  %s501_s6 = sshll.u32 %s663_s5, 4  ;;  %s502_s6 = int_to_ptr.vmem [resolvable:$true] %s501_s6 }
 0x161   :  { %v289_v32 = vmax.f32 %v285_v28, 0.0  ;;  %v286_v33 = vadd.f32 %v521_v17, %v275_v29  ;;  %s637_s14 = scalar_lea.vmem %s502_s6, 512  ;;  %p642_p1 = scmp.lt.s32.totalorder %s502_s6, %s502_s6 }
 0x162   :  { %v292_v34 = vmax.f32 %v288_v31, 0.0  ;;  %v295_v35 = vrot.slane %v291_v30, 7  ;;  %v307_v39 = vrot.slane %v291_v30, 1  ;;  %p638_p0 = scmp.ne.s32.totalorder %s502_s6, %s637_s14  ;;  %p643_p2 = scmp.lt.s32.totalorder %s637_s14, %s637_s14 }
 0x163   :  { %v293_v36 = vrot.slane %v289_v32, 7  ;;  %v305_v37 = vrot.slane %v289_v32, 1  ;;  %v290_v38 = vmax.f32 %v286_v33, 0.0 }
 0x164   :  { %v296_v41 = vrot.slane %v292_v34, 7  ;;  %v308_v42 = vrot.slane %v292_v34, 1  ;;  %v605_v43 = vpack.i.bf16 %v292_v34, %v291_v30  ;;  %p644_p3 = por %p643_p2, %p642_p1 }
 0x165   :  { %v294_v44 = vrot.slane %v290_v38, 7  ;;  %v306_v45 = vrot.slane %v290_v38, 1  ;;  %v610_v46 = vpack.i.bf16 %v290_v38, %v289_v32 }
 0x166   :  { %606 = vrot.lane.b32.xlu1 %v605_v43, %s661_s9  ;;  %v309_v48 = vsel %vm110_vm0, %v307_v39, %v308_v42  ;;  %v312_v49 = vsel %vm110_vm0, %v308_v42, %v305_v37  ;;  %v297_v50 = vsel %vm97_vm3, %v295_v35, %v296_v41  ;;  %v300_v51 = vsel %vm97_vm3, %v296_v41, %v293_v36  ;;  %p645_p4 = pnand %p644_p3, %p638_p0 }
 0x167   :  { %611 = vrot.lane.b32.xlu0 %v610_v46, %s661_s9  ;;  %v316_v52 = vsel %vm760_vm2, 0.0, %v312_v49  ;;  %v310_v53 = vsel %vm110_vm0, %v306_v45, %v307_v39  ;;  %v311_v54 = vsel %vm110_vm0, %v305_v37, %v306_v45  ;;  %v298_v55 = vsel %vm97_vm3, %v294_v44, %v295_v35 }
 0x168   :  { %v620_v56 = vpack.i.bf16 %v316_v52, %v309_v48  ;;  %v314_v57 = vsel %vm756_vm1, 0.0, %v310_v53  ;;  %v299_v58 = vsel %vm97_vm3, %v293_v36, %v294_v44  ;;  %v303_v7 = vsel %vm798_vm6, 0.0, %v298_v55 }
 0x169   :  { %v615_v59 = vpack.i.bf16 %v314_v57, %v311_v54  ;;  %v301_v6 = vsel %vm788_vm4, 0.0, %v300_v51 }
 0x16a   :  { %621 = vrot.lane.b32.xlu1 %v620_v56, %s662_s17 }
 0x16b   :  { %616 = vrot.lane.b32.xlu0 %v615_v59, %s662_s17 }
 0x1d8   :  { %v607_v23 = vpop.permute.xlu1 %606 }
 0x1d9   :  { %v612_v60 = vpop.permute.xlu0 %611  ;;  %v609_v61 = vunpack.i.h.bf16 %v607_v23  ;;  %v608_v62 = vunpack.i.l.bf16 %v607_v23 }
 0x1da   :  { %v614_v63 = vunpack.i.h.bf16 %v612_v60  ;;  %v613_v3 = vunpack.i.l.bf16 %v612_v60 }
 0x1db   :  { %v351_v10 = vsel %vm151_vm5, %v303_v7, %v608_v62  ;;  %v352_v11 = vsel %vm151_vm5, %v297_v50, %v609_v61 }
 0x1dc   :  { %v622_v4 = vpop.permute.xlu1 %621  ;;  %v349_v16 = vsel %vm151_vm5, %v301_v6, %v613_v3  ;;  %v350_v47 = vsel %vm151_vm5, %v299_v58, %v614_v63 }
 0x1dd   :  { %v624_v22 = vunpack.i.h.bf16 %v622_v4  ;;  %v623_v8 = vunpack.i.l.bf16 %v622_v4  ;;  %v617_v9 = vpop.permute.xlu0 %616 }
 0x1de   :  { %v619_v12 = vunpack.i.h.bf16 %v617_v9  ;;  %v618_v13 = vunpack.i.l.bf16 %v617_v9 }
 0x1df   :  { %v355_v14 = vsel %vm156_vm7, %v351_v10, %v623_v8  ;;  %v356_v15 = vsel %vm156_vm7, %v352_v11, %v624_v22 }
 0x1e0   :  { %v358_v17 = vpack.c.bf16 %v356_v15, %v355_v14  ;;  %v353_v18 = vsel %vm156_vm7, %v349_v16, %v618_v13  ;;  %v354_v40 = vsel %vm156_vm7, %v350_v47, %v619_v12 }
 0x1e1   :  { %v357_v19 = vpack.c.bf16 %v354_v40, %v353_v18 }
 0x1e3   :  { %576 = vmatprep.mubr.msk.bf16.mxu1 %vm211_vm8, %v357_v19 }
 0x1e4   :  { %577 = vmatmul.mubr.msk.bf16.vlgmr.msra.gmra.mrb[0].mxu1 %vm211_vm8, %v358_v17 }
 0x2b7   :  { %v578_v21 = vpop.f32.mrb[0].mxu1 }
 0x2b8   :  { %v471_v25 = vmul.f32 %v578_v21, %v530_v20  ;;  %v447_v26 = vpop.f32.mrb[1].mxu1 }
 0x2b9   :  { %v469_v27 = vmul.f32 %v530_v20, %v447_v26  ;;  %v579_v28 = vpop.f32.mrb[2].mxu1 }
 0x2ba   :  { %v482_v29 = vadd.f32 %v531_v24, %v471_v25  ;;  %v472_v30 = vmul.f32 %v579_v28, %v530_v20  ;;  %v450_v31 = vpop.f32.mrb[3].mxu1 }
 0x2bb   :  { %v480_v32 = vadd.f32 %v531_v24, %v469_v27  ;;  %v470_v33 = vmul.f32 %v530_v20, %v450_v31 }
 0x2bc   :  { %v486_v34 = vadd.f32 %v482_v29, %v719_v2  ;;  %v483_v35 = vadd.f32 %v531_v24, %v472_v30 }
 0x2bd   :  { %v484_v36 = vadd.f32 %v480_v32, %v709_v0  ;;  %v481_v37 = vadd.f32 %v531_v24, %v470_v33 }
 0x2be   :  { %v490_v38 = vmax.f32 %v486_v34, 0.0  ;;  %v487_v39 = vadd.f32 %v483_v35, %v726_v5 }
 0x2bf   :  { %v488_v41 = vmax.f32 %v484_v36, 0.0  ;;  %v485_v42 = vadd.f32 %v481_v37, %v714_v1 }
 0x2c0   :  { %494 = vst.msk [vmem:[#allocation2 + $0x10] sm:$0xff] %vm151_vm5, %v490_v38  ;;  %v491_v43 = vmax.f32 %v487_v39, 0.0 }
 0x2c1   :  { %492 = vst.msk [vmem:[#allocation2] sm:$0xff] %vm151_vm5, %v488_v41  ;;  %v489_v44 = vmax.f32 %v485_v42, 0.0 }
 0x2c2   :  { %495 = vst.msk [vmem:[#allocation2 + $0x18] sm:$0xff] %vm151_vm5, %v491_v43 }
 0x2c3   :  { %493 = vst.msk [vmem:[#allocation2 + $0x8] sm:$0xff] %vm151_vm5, %v489_v44 }
 0x2c4   :  { %648 = shalt.err (!%p645_p4)
}
 0x2c5   :  { %s649_s17 = scalar_lea.hbm %s913_s7, 512 }
 0x2c6   :  { %p650_p5 = scmp.ne.s32.totalorder %s913_s7, %s649_s17  ;;  %p653_p6 = scmp.lt.u32.totalorder %s649_s17, %s913_s7 }
 0x2c8   :  { %p655_p7 = pnand %p653_p6, %p650_p5 }
 0x2ca   :  { %658 = shalt.err (!%p655_p7)
}
 0x2cb   :  { %s664_s1 = smov 128   ;;  %s665_s22 = smov 8  }
 0x2cc   :  { %507 = dma.vmem_to_hbm [thread:$0]  %s502_s6, 512, %s913_s7, [#allocation3], %s664_s1, %s664_s1, %s665_s22  }
 0x2cd   :  { %659 = dma.done.wait [#allocation3], 512  }
 0x2ce   :  { %660 = vsyncadd [#allocation3], 4294966784 }
 0x2cf   :  { %511 = vsyncpa [#allocation3], 1 }

</bundles_post_ra>
